<compile_context>
chip_gen: v7x
topology: tpu7x:2x2x1
jax: 0.10.0
libtpu: 0.0.40
codegen_flags: <defaults>
</compile_context>

<pallas_src>
import jax
import jax.numpy as jnp
from jax.experimental import pallas as pl
from jax.experimental.pallas import tpu as pltpu


def _edge_graph_conv_kernel(adj_ref, feat_ref, w_ref, bias_ref, out_ref, sup_ref):
    """One grid step handles TB batches and ALL edges.

    adj_ref : (N, E*N)      compute dtype; edge-concat along lanes, pre-scaled by 1/E
    feat_ref: (TB, N, F)    compute dtype
    w_ref   : (E, F, Fo)    compute dtype
    bias_ref: (1, Fo)       float32
    out_ref : (TB, N, Fo)   output dtype
    sup_ref : (TB, E*N, Fo) VMEM scratch, compute dtype
    """
    n_edges = w_ref.shape[0]
    tb, n, f = feat_ref.shape
    fo = out_ref.shape[-1]
    cdt = feat_ref.dtype

    # (TB, N, F) -> (TB*N, F); layout-free because N % 8 == 0 (wrapper pads).
    feat2d = feat_ref[...].reshape(tb * n, f)

    # Stage 1: per-edge support, f32 accumulation on the MXU, staged row-stacked
    # into VMEM scratch at sublane offset e*N.  Only one slab is live at a time.
    for e in range(n_edges):
        sup_e = jnp.dot(feat2d, w_ref[e], preferred_element_type=jnp.float32)
        sup_ref[:, e * n:(e + 1) * n, :] = sup_e.reshape(tb, n, fo).astype(cdt)

    # Stage 2: E-folded contraction per batch.  adjacency already carries the
    # 1/E mean factor, so the epilogue is just bias + relu.
    adj = adj_ref[...]                       # (N, E*N)
    bias = bias_ref[...]                     # (1, Fo), broadcasts over N
    for b in range(tb):
        acc = jnp.dot(adj, sup_ref[b], preferred_element_type=jnp.float32)
        out_ref[b] = jnp.maximum(acc + bias, 0.0).astype(out_ref.dtype)


def edge_graph_conv(adjacency, feature, weight, bias, *,
                    compute_dtype=jnp.bfloat16, out_dtype=None, tb=None):
    """adjacency: (E, N, N), feature: (B, N, F), weight: (E, F, Fo), bias: (Fo,)."""
    E, N, _ = adjacency.shape
    B, _, F = feature.shape
    Fo = weight.shape[-1]
    if out_dtype is None:
        out_dtype = compute_dtype

    # Pad N up to a multiple of 8 so sublane merges/reshapes inside the kernel
    # are layout-free.  Zero padding is exact: padded feature rows give zero
    # support rows; padded output rows are sliced off below.
    Np = ((N + 7) // 8) * 8
    if Np != N:
        adjacency = jnp.pad(adjacency, ((0, 0), (0, Np - N), (0, Np - N)))
        feature = jnp.pad(feature, ((0, 0), (0, Np - N), (0, 0)))

    # Edge-concat adjacency along lanes and fold the 1/E mean into it:
    #   A_cat[n, e*Np + m] = adjacency[e, n, m] / E
    adj_cat = (jnp.transpose(adjacency, (1, 0, 2)).reshape(Np, E * Np)
               * (1.0 / E)).astype(compute_dtype)
    feat_c = feature.astype(compute_dtype)
    w_c = weight.astype(compute_dtype)
    bias2d = bias.reshape(1, Fo).astype(jnp.float32)

    # Batch tile: aim for TB*Np ~ 512 rows (fills the MXU M-dim, amortizes
    # grid-step overhead), but keep the grid length >= 2 when possible so both
    # v7x TensorCores get grid steps.
    if tb is None:
        cap = max(1, min(B, max(1, 512 // Np)))
        if B >= 2:
            cap = max(1, min(cap, B // 2))
        tb = next(t for t in range(cap, 0, -1) if B % t == 0)
    assert B % tb == 0

    out = pl.pallas_call(
        _edge_graph_conv_kernel,
        out_shape=jax.ShapeDtypeStruct((B, Np, Fo), out_dtype),
        grid_spec=pltpu.PrefetchScalarGridSpec(
            num_scalar_prefetch=0,
            grid=(B // tb,),
            in_specs=[
                pl.BlockSpec((Np, E * Np), lambda i: (0, 0)),     # adjacency (resident)
                pl.BlockSpec((tb, Np, F), lambda i: (i, 0, 0)),   # feature batch tile
                pl.BlockSpec((E, F, Fo), lambda i: (0, 0, 0)),    # weight (resident)
                pl.BlockSpec((1, Fo), lambda i: (0, 0)),          # bias
            ],
            out_specs=pl.BlockSpec((tb, Np, Fo), lambda i: (i, 0, 0)),
            scratch_shapes=[pltpu.VMEM((tb, E * Np, Fo), compute_dtype)],
        ),
        compiler_params=pltpu.CompilerParams(
            dimension_semantics=("parallel",),
            # Blocks are KB-MB scale: default scoped VMEM (16/32 MiB) is ample;
            # do NOT claim v7x's whole 64 MiB physical budget.
        ),
    )(adj_cat, feat_c, w_c, bias2d)

    return out[:, :N, :] if Np != N else out


def edge_graph_conv_ref(adjacency, feature, weight, bias):
    """Pure-JAX reference mirroring the PyTorch forward."""
    feat = feature[:, None, :, :]                          # (B, 1, N, F)
    support = jnp.matmul(feat, weight[None])               # (B, E, N, Fo)
    output = jnp.matmul(adjacency[None], support)          # (B, E, N, Fo)
    output = jnp.mean(output, axis=1)                      # (B, N, Fo)
    output = output + bias.reshape(1, 1, -1)
    return jnp.maximum(output, 0.0)


if __name__ == "__main__":
    # Small shapes consistent with the module.
    B, E, N, F, Fo = 2, 3, 16, 8, 32

    key = jax.random.PRNGKey(0)
    k_w, k_adj, k_feat = jax.random.split(key, 3)

    # Deterministic parameter init (torch.rand -> uniform[0,1); bias zeros).
    weight = jax.random.uniform(k_w, (E, F, Fo), dtype=jnp.float32)
    bias = jnp.zeros((Fo,), dtype=jnp.float32)

    adjacency = jax.random.uniform(k_adj, (E, N, N), dtype=jnp.float32)
    feature = jax.random.normal(k_feat, (B, N, F), dtype=jnp.float32)

    ref = edge_graph_conv_ref(adjacency, feature, weight, bias)

    # Exact-precision path (f32 operands, f32 accumulation) -- tight check.
    out_f32 = jax.block_until_ready(
        edge_graph_conv(adjacency, feature, weight, bias,
                        compute_dtype=jnp.float32))
    assert out_f32.shape == (B, N, Fo)
    assert jnp.allclose(out_f32, ref, atol=1e-3, rtol=1e-3), "f32 mismatch vs reference"

    # Fast path (bf16 operands + bf16 output, f32 accumulation) -- loose check.
    out_bf16 = jax.block_until_ready(
        edge_graph_conv(adjacency, feature, weight, bias,
                        compute_dtype=jnp.bfloat16))
    assert out_bf16.shape == (B, N, Fo)
    assert out_bf16.dtype == jnp.bfloat16
    assert jnp.allclose(out_bf16.astype(jnp.float32), ref,
                        atol=1e-1, rtol=5e-2), "bf16 mismatch vs reference"

    print("KERNEL_OK")
</pallas_src>

<mosaic_0001>
module attributes {stable_mosaic.version = 11 : i64} {
  func.func @_edge_graph_conv_kernel(%arg0: i32, %arg1: memref<16x48xf32, #tpu.memory_space<vmem>>, %arg2: memref<1x16x8xf32, #tpu.memory_space<vmem>>, %arg3: memref<3x8x32xf32, #tpu.memory_space<vmem>>, %arg4: memref<1x32xf32, #tpu.memory_space<vmem>>, %arg5: memref<1x16x32xf32, #tpu.memory_space<vmem>>, %arg6: memref<1x48x32xf32, #tpu.memory_space<vmem>>) attributes {dimension_semantics = [#tpu.dimension_semantics<parallel>], iteration_bounds = array<i64: 2>, scalar_prefetch = 0 : i64, scratch_operands = 1 : i64, tpu.core_type = #tpu.core_type<tc>, window_params = [{pipeline_mode = #tpu.pipeline_mode<synchronous>, transform_indices = @transform_0, window_bounds = array<i64: 16, 48>}, {transform_indices = @transform_1, window_bounds = array<i64: 1, 16, 8>}, {pipeline_mode = #tpu.pipeline_mode<synchronous>, transform_indices = @transform_2, window_bounds = array<i64: 3, 8, 32>}, {pipeline_mode = #tpu.pipeline_mode<synchronous>, transform_indices = @transform_3, window_bounds = array<i64: 1, 32>}, {transform_indices = @transform_4, window_bounds = array<i64: 1, 16, 32>}]} {
    %c0 = arith.constant 0 : index
    %c0_0 = arith.constant 0 : index
    %c0_1 = arith.constant 0 : index
    %0 = vector.load %arg2[%c0, %c0_0, %c0_1] : memref<1x16x8xf32, #tpu.memory_space<vmem>>, vector<1x16x8xf32>
    %1 = vector.shape_cast %0 : vector<1x16x8xf32> to vector<16x8xf32>
    %c0_2 = arith.constant 0 : index
    %c0_3 = arith.constant 0 : index
    %c0_4 = arith.constant 0 : index
    %2 = vector.load %arg3[%c0_2, %c0_3, %c0_4] : memref<3x8x32xf32, #tpu.memory_space<vmem>>, vector<1x8x32xf32>
    %3 = vector.shape_cast %2 : vector<1x8x32xf32> to vector<8x32xf32>
    %cst = arith.constant dense<0.000000e+00> : vector<16x32xf32>
    %4 = tpu.matmul %1, %3, %cst {dimension_numbers = #tpu.dot_dimension_numbers<[1], [0], [0], [1], [0, 0, 1, 1], [], []>} : vector<16x8xf32>, vector<8x32xf32>, vector<16x32xf32> -> vector<16x32xf32>
    %5 = vector.shape_cast %4 : vector<16x32xf32> to vector<1x16x32xf32>
    %c0_5 = arith.constant 0 : index
    %c0_6 = arith.constant 0 : index
    %c0_7 = arith.constant 0 : index
    %6 = vector.load %arg6[%c0_5, %c0_6, %c0_7] : memref<1x48x32xf32, #tpu.memory_space<vmem>>, vector<1x16x32xf32>
    tpu.vector_store %arg6[%c0_5, %c0_6, %c0_7], %5 {strides = array<i32>} : memref<1x48x32xf32, #tpu.memory_space<vmem>>, vector<1x16x32xf32>,
    %c1 = arith.constant 1 : index
    %c0_8 = arith.constant 0 : index
    %c0_9 = arith.constant 0 : index
    %7 = vector.load %arg3[%c1, %c0_8, %c0_9] : memref<3x8x32xf32, #tpu.memory_space<vmem>>, vector<1x8x32xf32>
    %8 = vector.shape_cast %7 : vector<1x8x32xf32> to vector<8x32xf32>
    %cst_10 = arith.constant dense<0.000000e+00> : vector<16x32xf32>
    %9 = tpu.matmul %1, %8, %cst_10 {dimension_numbers = #tpu.dot_dimension_numbers<[1], [0], [0], [1], [0, 0, 1, 1], [], []>} : vector<16x8xf32>, vector<8x32xf32>, vector<16x32xf32> -> vector<16x32xf32>
    %10 = vector.shape_cast %9 : vector<16x32xf32> to vector<1x16x32xf32>
    %c0_11 = arith.constant 0 : index
    %c16 = arith.constant 16 : index
    %c0_12 = arith.constant 0 : index
    %11 = vector.load %arg6[%c0_11, %c16, %c0_12] : memref<1x48x32xf32, #tpu.memory_space<vmem>>, vector<1x16x32xf32>
    tpu.vector_store %arg6[%c0_11, %c16, %c0_12], %10 {strides = array<i32>} : memref<1x48x32xf32, #tpu.memory_space<vmem>>, vector<1x16x32xf32>,
    %c2 = arith.constant 2 : index
    %c0_13 = arith.constant 0 : index
    %c0_14 = arith.constant 0 : index
    %12 = vector.load %arg3[%c2, %c0_13, %c0_14] : memref<3x8x32xf32, #tpu.memory_space<vmem>>, vector<1x8x32xf32>
    %13 = vector.shape_cast %12 : vector<1x8x32xf32> to vector<8x32xf32>
    %cst_15 = arith.constant dense<0.000000e+00> : vector<16x32xf32>
    %14 = tpu.matmul %1, %13, %cst_15 {dimension_numbers = #tpu.dot_dimension_numbers<[1], [0], [0], [1], [0, 0, 1, 1], [], []>} : vector<16x8xf32>, vector<8x32xf32>, vector<16x32xf32> -> vector<16x32xf32>
    %15 = vector.shape_cast %14 : vector<16x32xf32> to vector<1x16x32xf32>
    %c0_16 = arith.constant 0 : index
    %c32 = arith.constant 32 : index
    %c0_17 = arith.constant 0 : index
    %16 = vector.load %arg6[%c0_16, %c32, %c0_17] : memref<1x48x32xf32, #tpu.memory_space<vmem>>, vector<1x16x32xf32>
    tpu.vector_store %arg6[%c0_16, %c32, %c0_17], %15 {strides = array<i32>} : memref<1x48x32xf32, #tpu.memory_space<vmem>>, vector<1x16x32xf32>,
    %c0_18 = arith.constant 0 : index
    %c0_19 = arith.constant 0 : index
    %17 = vector.load %arg1[%c0_18, %c0_19] : memref<16x48xf32, #tpu.memory_space<vmem>>, vector<16x48xf32>
    %c0_20 = arith.constant 0 : index
    %c0_21 = arith.constant 0 : index
    %18 = vector.load %arg4[%c0_20, %c0_21] : memref<1x32xf32, #tpu.memory_space<vmem>>, vector<1x32xf32>
    %c0_22 = arith.constant 0 : index
    %c0_23 = arith.constant 0 : index
    %c0_24 = arith.constant 0 : index
    %19 = vector.load %arg6[%c0_22, %c0_23, %c0_24] : memref<1x48x32xf32, #tpu.memory_space<vmem>>, vector<1x48x32xf32>
    %20 = vector.shape_cast %19 : vector<1x48x32xf32> to vector<48x32xf32>
    %cst_25 = arith.constant dense<0.000000e+00> : vector<16x32xf32>
    %21 = tpu.matmul %17, %20, %cst_25 {dimension_numbers = #tpu.dot_dimension_numbers<[1], [0], [0], [1], [0, 0, 1, 1], [], []>} : vector<16x48xf32>, vector<48x32xf32>, vector<16x32xf32> -> vector<16x32xf32>
    %22 = vector.broadcast %18 : vector<1x32xf32> to vector<16x32xf32>
    %23 = arith.addf %21, %22 : vector<16x32xf32>
    %cst_26 = arith.constant 0.000000e+00 : f32
    %24 = vector.broadcast %cst_26 : f32 to vector<16x32xf32>
    %25 = arith.maximumf %23, %24 : vector<16x32xf32>
    %c0_27 = arith.constant 0 : index
    %c0_28 = arith.constant 0 : index
    %c0_29 = arith.constant 0 : index
    %26 = vector.load %arg5[%c0_27, %c0_28, %c0_29] : memref<1x16x32xf32, #tpu.memory_space<vmem>>, vector<1x16x32xf32>
    %27 = vector.shape_cast %26 : vector<1x16x32xf32> to vector<16x32xf32>
    %28 = vector.shape_cast %25 : vector<16x32xf32> to vector<1x16x32xf32>
    tpu.vector_store %arg5[%c0_27, %c0_28, %c0_29], %28 {strides = array<i32>} : memref<1x16x32xf32, #tpu.memory_space<vmem>>, vector<1x16x32xf32>,
    return
  }
  func.func @transform_0(%arg0: i32) -> (i32, i32) {
    %c0_i32 = arith.constant 0 : i32
    %c0_i32_0 = arith.constant 0 : i32
    %c0_i32_1 = arith.constant 0 : i32
    return %c0_i32, %c0_i32_0 : i32, i32
  }
  func.func @transform_1(%arg0: i32) -> (i32, i32, i32) {
    %c0_i32 = arith.constant 0 : i32
    %c0_i32_0 = arith.constant 0 : i32
    %c0_i32_1 = arith.constant 0 : i32
    return %arg0, %c0_i32, %c0_i32_0 : i32, i32, i32
  }
  func.func @transform_2(%arg0: i32) -> (i32, i32, i32) {
    %c0_i32 = arith.constant 0 : i32
    %c0_i32_0 = arith.constant 0 : i32
    %c0_i32_1 = arith.constant 0 : i32
    %c0_i32_2 = arith.constant 0 : i32
    return %c0_i32, %c0_i32_0, %c0_i32_1 : i32, i32, i32
  }
  func.func @transform_3(%arg0: i32) -> (i32, i32) {
    %c0_i32 = arith.constant 0 : i32
    %c0_i32_0 = arith.constant 0 : i32
    %c0_i32_1 = arith.constant 0 : i32
    return %c0_i32, %c0_i32_0 : i32, i32
  }
  func.func @transform_4(%arg0: i32) -> (i32, i32, i32) {
    %c0_i32 = arith.constant 0 : i32
    %c0_i32_0 = arith.constant 0 : i32
    %c0_i32_1 = arith.constant 0 : i32
    return %arg0, %c0_i32, %c0_i32_0 : i32, i32, i32
  }
}

</mosaic_0001>

<bundles_post_ra>
// kernel: tpu_custom_call.1
= control target key start
LH: loop header
LB: loop body
LE: loop exit
PB: predicated region body
PF: predicated region fallthrough
CT: control target
= control target key end

     0   :  { %9 = vsyncpa [#allocation4], 0  ;;  %s967_s0 = inlined_call_operand.vmem [shape: f32[16,48], index: 0, kind: input, shape index: {}]   ;;  %s968_s1 = inlined_call_operand.vmem [shape: f32[2,16,8], index: 1, kind: input, shape index: {}]   ;;  %s969_s2 = inlined_call_operand.vmem [shape: f32[3,8,32], index: 2, kind: input, shape index: {}]   ;;  %s970_s3 = inlined_call_operand.vmem [shape: f32[1,32], index: 3, kind: input, shape index: {}]   ;;  %s971_s4 = inlined_call_operand.hbm [shape: f32[2,16,32], index: 4, kind: output, shape index: {}]  }
   0x1   :  { %11 = vsyncpa [#allocation4 + $0x1], 0  ;;  %s836_s15 = smov 0   ;;  %s838_s16 = smov 0  }
   0x2   :  { %s840_s17 = smov 0   ;;  %s842_s18 = smov 0  }
   0x3 LB: > { %s857_s19 = sadd.s32 4294967295, %s806_s18   ;;  %s619_s20 = sadd.s32 4294967294, %s806_s18   ;;  %s806_s18 = sphi %s842_s18, %s977_s18   ;;  %s802_s17 = sphi %s840_s17, %s976_s17   ;;  %s798_s16 = sphi %s838_s16, %s975_s16   ;;  %s794_s15 = sphi %s836_s15, %s974_s15  }
   0x4   : > { %s861_s21 = sadd.s32 1, %s806_s18   ;;  %s113_s22 = sadd.s32 1, %s802_s17 }
   0x5   : > { %s110_s23 = ssub.s32 %s806_s18, %s861_s21  ;;  %p123_p0 = scmp.ne.s32.totalorder %s802_s17, %s798_s16 }
   0x6   : > { %p111_p1 = scmp.eq.s32.totalorder %s110_s23, 0  ;;  %p124_p2 = scmp.eq.s32.totalorder %s857_s19, 1 }
   0x7   : > { %p129_p3 = scmp.ne.s32.totalorder %s798_s16, %s794_s15  ;;  %p130_p4 = scmp.eq.s32.totalorder %s619_s20, 1 }
   0x8   : > { %s872_s24 = scalar_select %p111_p1, %s802_s17, %s113_s22  }
   0x9   : > { %p874_p5 = por %p124_p2, %p123_p0  ;;  %p878_p6 = por %p130_p4, %p129_p3 }
   0xa   : > { %p622_p7 = scmp.ge.s32.totalorder %s806_s18, 1  ;;  %p165_p8 = scmp.lt.s32.totalorder %s806_s18, 3 }
   0xc   : > { %p166_p9 = pnand %p622_p7, %p165_p8 }
   0xd   : > { %v198_v0 = vld [vmem:[%s969_s2] sm:$0xff] (!%p166_p9)  ;;  %p191_p10 = scmp.lt.s32.totalorder (!%p166_p9), %s857_s19, 1  ;;  %v628_v1 = vld [vmem:[%s969_s2 + $0x8] sm:$0xff] (!%p166_p9)  ;;  %vm199_vm0 = vcmask (!%p166_p9), 64512   ;;  %v631_v4 = vld [vmem:[%s969_s2 + $0x10] sm:$0xff] (!%p166_p9)  ;;  %vm457_vm1 = vcmask (!%p166_p9), 392192  }
   0xe   : > { %169 = sbr.rel (%p166_p9) target bundleno = 494 (0x1ee), region = 36  ;;  %661 = vmatprep.subr.mxu0 (!%p166_p9), %v198_v0  ;;  %v442_v5 = vld [vmem:[%s967_s0] sm:$0xff] (!%p166_p9)  ;;  %vm281_vm2 = vcmask (!%p166_p9), 261120   ;;  %v443_v21 = vld [vmem:[%s967_s0 + $0x8] sm:$0xff] (!%p166_p9)  ;;  %s188_s22 = sand.u32 (!%p166_p9), 1, %s798_s16  }
   0xf   : > { %662 = vmatpush3.msra.mxu0 (!%p166_p9), %v198_v0  ;;  %688 = vmatprep.mubr.msk.f32.mxu1 (!%p166_p9), %vm457_vm1, %v442_v5  ;;  %s623_s23 = sshll.u32 (!%p166_p9), %s188_s22, 4  ;;  %v634_v22 = vld [vmem:[%s970_s3] ss:$0 sm:$0xff] (!%p166_p9)  ;;  %s808_s10 = smov (!%p166_p9), [#allocation3]  }
  0x10   : > { %666 = vmatprep.subr.mxu0 (!%p166_p9), %v628_v1  ;;  %s190_s29 = scalar_lea.vmem (!%p166_p9), [#allocation3], %s623_s23  ;;  %s748_s11 = sshll.u32 (!%p166_p9), %s808_s10, 4  ;;  %s749_s11 = int_to_ptr.vmem [resolvable:$false] %s748_s11 }
  0x11   : > { %s557_s30 = sshll.u32 (!%p166_p9), %s190_s29, 4  ;;  %s750_s12 = scalar_lea.vmem (!%p166_p9), %s749_s11, 512  ;;  %s917_s30 = int_to_ptr.vmem [resolvable:$true] %s557_s30 }
  0x12   : > { %p751_p0 = scmp.lt.s32.totalorder (!%p166_p9), %s917_s30, %s749_s11 }
  0x15   : > { %s192_s5 = scalar_select %p191_p10, %s857_s19, 1 }
  0x17   : > { %s642_s6 = sshll.u32 %s192_s5, 4  ;;  %s643_s5 = sshll.u32 %s857_s19, 8 }
  0x18   : > { %s195_s9 = scalar_lea.vmem %s968_s1, %s642_s6  ;;  %s922_s8 = scalar_lea.hbm %s971_s4, %s643_s5 }
  0x19   : > { %v196_v2 = vld [vmem:[%s195_s9] sm:$0xff]  ;;  %v197_v3 = vld [vmem:[%s195_s9 + $0x8] sm:$0xff]  ;;  %s926_s19 = scalar_lea.sflag [#allocation4], %s188_s22  ;;  %s744_s9 = scalar_lea.vmem %s917_s30, 256 }
  0x1a   : > { %663 = vmatprep.mubr.msk.f32.mxu0 %vm199_vm0, %v196_v2  ;;  %p745_p11 = scmp.ne.s32.totalorder %s917_s30, %s744_s9  ;;  %p752_p1 = scmp.lt.s32.totalorder %s750_s12, %s744_s9 }
  0x1b   : > { %664 = vmatmul.mubr.msk.f32.vlgmr.msra.gmra.mrb[0].mxu0 %vm199_vm0, %v197_v3 }
  0x1c   : > { %667 = vmatpush3.msra.mxu0 %v628_v1  ;;  %668 = vmatprep.mubr.msk.f32.mxu0 %vm199_vm0, %v196_v2  ;;  %p746_p12 = pnand %p745_p11, %p874_p5  ;;  %p753_p2 = por %p752_p1, %p751_p0 }
  0x1d   : > { %671 = vmatprep.subr.mxu0 %v631_v4 }
  0x1e   : > { %p747_p13 = pneg %p746_p12 }
  0x1f   : > { %669 = vmatmul.mubr.msk.f32.vlgmr.msra.gmra.mrb[2].mxu0 %vm199_vm0, %v197_v3 }
  0x20   : > { %672 = vmatpush3.msra.mxu0 %v631_v4  ;;  %673 = vmatprep.mubr.msk.f32.mxu0 %vm199_vm0, %v196_v2  ;;  %p754_p3 = pnand %p753_p2, %p747_p13 }
  0x23   : > { %674 = vmatmul.mubr.msk.f32.vlgmr.msra.gmra.mrb[4].mxu0 %vm199_vm0, %v197_v3 }
  0xee   : > { %v665_v6 = vpop.f32.mrb[0].mxu0 }
  0xef   : > { %283 = vst.msk [vmem:[#allocation2 + $0x8] sm:$0xff] %vm281_vm2, %v665_v6  ;;  %v272_v7 = vpop.f32.mrb[1].mxu0 }
  0xf0   : > { %282 = vst.msk [vmem:[#allocation2] sm:$0xff] %vm281_vm2, %v272_v7 }
  0xf2   : > { %v670_v8 = vpop.f32.mrb[2].mxu0 }
  0xf3   : > { %362 = vst.msk [vmem:[#allocation2 + $0x18] sm:$0xff] %vm281_vm2, %v670_v8  ;;  %v352_v9 = vpop.f32.mrb[3].mxu0 }
  0xf4   : > { %361 = vst.msk [vmem:[#allocation2 + $0x10] sm:$0xff] %vm281_vm2, %v352_v9 }
  0xf6   : > { %v675_v10 = vpop.f32.mrb[4].mxu0  ;;  %v446_v11 = vld [vmem:[#allocation2 + $0x8] sm:$0xff] }
  0xf7   : > { %441 = vst.msk [vmem:[#allocation2 + $0x28] sm:$0xff] %vm281_vm2, %v675_v10  ;;  %v431_v12 = vpop.f32.mrb[5].mxu0  ;;  %v445_v13 = vld [vmem:[#allocation2] sm:$0xff] }
  0xf8   : > { %440 = vst.msk [vmem:[#allocation2 + $0x20] sm:$0xff] %vm281_vm2, %v431_v12  ;;  %v691_v14 = vpack.c.bf16 %v446_v11, %v445_v13 }
  0xfa   : > { %692 = vmatprep.subr.bf16.mxu1 %v691_v14  ;;  %v448_v15 = vld [vmem:[#allocation2 + $0x18] sm:$0xff] }
  0xfb   : > { %694 = vmatpush3.bf16.msra.mxu1 %v691_v14  ;;  %v447_v16 = vld [vmem:[#allocation2 + $0x10] sm:$0xff] }
  0xfc   : > { %v695_v17 = vpack.c.bf16 %v448_v15, %v447_v16 }
  0xfe   : > { %696 = vmatprep.subr.bf16.mxu1 %v695_v17  ;;  %v450_v18 = vld [vmem:[#allocation2 + $0x28] sm:$0xff] }
  0xff   : > { %698 = vmatpush3.bf16.msra.mxu1 %v695_v17  ;;  %v449_v19 = vld [vmem:[#allocation2 + $0x20] sm:$0xff] }
 0x100   : > { %v699_v20 = vpack.c.bf16 %v450_v18, %v449_v19 }
 0x102   : > { %700 = vmatprep.subr.bf16.mxu1 %v699_v20 }
 0x103   : > { %702 = vmatpush3.bf16.msra.mxu1 %v699_v20 }
 0x106   : > { %689 = vmatmul.mubr.msk.f32.vlgmr.msra.gmra.mrb[0].mxu1 %vm457_vm1, %v443_v21 }
 0x1d9   : > { %v690_v23 = vpop.f32.mrb[0].mxu1 }
 0x1da   : > { %v536_v24 = vadd.f32 %v690_v23, %v634_v22  ;;  %v530_v25 = vpop.f32.mrb[1].mxu1 }
 0x1db   : > { %v531_v26 = vadd.f32 %v634_v22, %v530_v25 }
 0x1dc   : > { %v540_v27 = vmax.f32 %v536_v24, 0.0 }
 0x1dd   : > { %v539_v28 = vmax.f32 %v531_v26, 0.0 }
 0x1de   : > { %542 = vst.msk [vmem:[%s190_s29 + $0x8] sm:$0xff] %vm281_vm2, %v540_v27 }
 0x1df   : > { %541 = vst.msk [vmem:[%s190_s29] sm:$0xff] %vm281_vm2, %v539_v28 }
 0x1e0   : > { %757 = shalt.err (!%p754_p3)
}
 0x1e1   : > { %s758_s13 = scalar_lea.hbm %s922_s8, 256  ;;  %s762_s22 = scalar_lea.hbm %s971_s4, 512 }
 0x1e2   : > { %p759_p4 = scmp.ne.s32.totalorder %s922_s8, %s758_s13  ;;  %p763_p9 = scmp.lt.u32.totalorder %s922_s8, %s971_s4 }
 0x1e3   : > { %p764_p10 = scmp.lt.u32.totalorder %s762_s22, %s758_s13  ;;  %p766_p12 = scmp.lt.u32.totalorder %s758_s13, %s922_s8 }
 0x1e4   : > { %p760_p7 = pnand %p759_p4, %p874_p5 }
 0x1e5   : > { %p765_p11 = por %p764_p10, %p763_p9 }
 0x1e6   : > { %p761_p8 = pneg %p760_p7 }
 0x1e7   : > { %p767_p13 = por %p766_p12, %p765_p11 }
 0x1e9   : > { %p768_p0 = pnand %p767_p13, %p761_p8 }
 0x1eb   : > { %771 = shalt.err (!%p768_p0)
}
 0x1ec   : > { %s809_s28 = smov 128   ;;  %s810_s29 = smov 8  }
 0x1ed   : > { %703 = dma.vmem_to_hbm [thread:$0]  (%p874_p5), %s917_s30, 256, %s922_s8, %s926_s19, %s809_s28, %s809_s28, %s810_s29  }
 0x1ee PF: > { %p709_p1 = scmp.ge.s32.totalorder %s806_s18, 2  ;;  %s572_s5 = sand.u32 1, %s794_s15  }
 0x1ef   : > { %s573_s6 = scalar_lea.sflag [#allocation4], %s572_s5 }
 0x1f0   : > { %p706_p2 = pnand %p709_p1, %p878_p6 }
 0x1f2   : > { %789 = dma.done.wait (!%p706_p2), %s573_s6, 256  }
 0x1f3   : > { %791 = vsyncadd (!%p706_p2), %s573_s6, 4294967040  ;;  %p14_p3 = scmp.ge.s32.totalorder %s861_s21, 4   ;;  %s974_s15 = smov %s798_s16 }
 0x1f4   : > { %s975_s16 = smov %s802_s17  ;;  %s976_s17 = smov %s872_s24 }
 0x1f5   : > { %s977_s18 = smov %s861_s21  ;;  %16 = sbr.rel (!%p14_p3) target bundleno = 3 (0x3), region = 73 }
 0x1fc   :  { %578 = vsyncpa [#allocation4], 1 }
 0x1fd   :  { %580 = vsyncpa [#allocation4 + $0x1], 1 }

</bundles_post_ra>
